<compile_context>
chip_gen: v5e
topology: v5e:2x2
jax: 0.10.0
libtpu: 0.0.40
codegen_flags: <defaults>
</compile_context>

<pallas_src>
import jax
import jax.numpy as jnp
import numpy as np
from jax import lax
from jax.experimental import pallas as pl
from jax.experimental.pallas import tpu as pltpu  # noqa: F401  (TPU backend)

# --- model hyper-parameters (small, consistent with the module) -------------
N_HEAD = 2
D_MODEL = 32
D_HEAD = 8
HD = N_HEAD * D_HEAD                 # 16
SCALE = 1.0 / (D_HEAD ** 0.5)

SEQ = 8    # sequence length S
BATCH = 2  # batch size B


def _mha_kernel(x_ref, wqkv_ref, wo_ref, o_ref):
    """Fused multi-head self-attention, single invocation (eval, no mask).

    x_ref   : (B*S, D_MODEL)   batch-major rows: row b*S + s == h[s, b, :]
    wqkv_ref: (D_MODEL, 3*HD)  fused [wq | wk | wv] projection weight
    wo_ref  : (HD, D_MODEL)    o_net weight (in, out)
    o_ref   : (B*S, D_MODEL)
    """
    x = x_ref[...]                                               # (16, 32)

    # One fused QKV projection for all batches and heads: 1 MXU push.
    qkv = jnp.dot(x, wqkv_ref[...],
                  preferred_element_type=jnp.float32)            # (16, 48)

    head_cols = []
    for hh in range(N_HEAD):                       # static unroll (H = 2)
        c0 = hh * D_HEAD
        qh = qkv[:, c0:c0 + D_HEAD]                # (B*S, Dh) static lane slice
        kh = qkv[:, HD + c0:HD + c0 + D_HEAD]
        vh = qkv[:, 2 * HD + c0:2 * HD + c0 + D_HEAD]

        per_b = []
        for b in range(BATCH):                     # static unroll (B = 2)
            r0 = b * SEQ
            q = qh[r0:r0 + SEQ]                    # (S, Dh) static sublane slice
            k = kh[r0:r0 + SEQ]
            v = vh[r0:r0 + SEQ]

            # attn_score[i, j] = <q_i, k_j> * scale
            # (contract last dims of both operands: no explicit k.T relayout)
            s = lax.dot_general(q, k, (((1,), (1,)), ((), ())),
                                preferred_element_type=jnp.float32) * SCALE  # (S, S)

            # softmax over the key axis (== PyTorch dim=1 of 'ijbn');
            # exact reciprocal per perf review (approx buys nothing here).
            s = s - jnp.max(s, axis=-1, keepdims=True)
            p = jnp.exp(s)
            p = p / jnp.sum(p, axis=-1, keepdims=True)

            per_b.append(jnp.dot(p, v, preferred_element_type=jnp.float32))  # (S, Dh)

        head_cols.append(jnp.concatenate(per_b, axis=0))         # (B*S, Dh)

    attn_vec = jnp.concatenate(head_cols, axis=-1)               # (B*S, HD)

    # One fused output projection across batch: 1 MXU push, contiguous store.
    out = jnp.dot(attn_vec, wo_ref[...], preferred_element_type=jnp.float32)
    o_ref[...] = out.astype(o_ref.dtype)
    # TODO(synk): attn_mask branch (2-D / 3-D masks) not implemented; this is
    # the attn_mask=None path only.


@jax.jit
def multi_head_attn(h, wq, wkv, wo):
    """h: (S, B, D_MODEL) -> (S, B, D_MODEL); matches MultiHeadAttn.forward
    with attn_mask=None in eval mode (dropouts are identity; this module's
    forward applies no residual / layer_norm).

    Weights are stored as (in_features, out_features), i.e. nn.Linear.weight.T.
    """
    S, B, D = h.shape
    assert (S, B, D) == (SEQ, BATCH, D_MODEL)

    # Fused [wq | wk | wv] projection weight (tiny one-off op on weights only).
    wqkv = jnp.concatenate([wq, wkv[:, :HD], wkv[:, HD:]], axis=-1)   # (D, 3*HD)

    # Batch-major 2-D activation layout: row b*S + s == h[s, b, :].
    x2 = jnp.transpose(h, (1, 0, 2)).reshape(B * S, D)                # (16, 32)

    out2 = pl.pallas_call(
        _mha_kernel,
        out_shape=jax.ShapeDtypeStruct((B * S, D), h.dtype),
        grid=(1,),  # whole problem in one invocation (< 16 KiB resident)
        in_specs=[
            pl.BlockSpec((B * S, D), lambda i: (0, 0)),       # x2
            pl.BlockSpec((D, 3 * HD), lambda i: (0, 0)),      # fused QKV weight
            pl.BlockSpec((HD, D), lambda i: (0, 0)),          # o_net weight
        ],
        out_specs=pl.BlockSpec((B * S, D), lambda i: (0, 0)),
    )(x2, wqkv, wo)

    return out2.reshape(B, S, D).transpose(1, 0, 2)                   # (S, B, D)


def _reference(h, wq, wkv, wo):
    """Pure-JAX reference mirroring the PyTorch forward (eval mode, no mask),
    evaluated at HIGHEST matmul precision (full f32)."""
    S, B, D = h.shape
    hp = jax.lax.Precision.HIGHEST
    head_q = jnp.einsum('sbd,de->sbe', h, wq, precision=hp)           # (S, B, HD)
    head_kv = jnp.einsum('sbd,de->sbe', h, wkv, precision=hp)         # (S, B, 2*HD)
    head_k, head_v = jnp.split(head_kv, 2, axis=-1)
    head_q = head_q.reshape(S, B, N_HEAD, D_HEAD)
    head_k = head_k.reshape(S, B, N_HEAD, D_HEAD)
    head_v = head_v.reshape(S, B, N_HEAD, D_HEAD)
    attn_score = jnp.einsum('ibnd,jbnd->ijbn', head_q, head_k, precision=hp) * SCALE
    attn_prob = jax.nn.softmax(attn_score, axis=1)
    attn_vec = jnp.einsum('ijbn,jbnd->ibnd', attn_prob, head_v, precision=hp)
    attn_vec = attn_vec.reshape(S, B, N_HEAD * D_HEAD)
    return jnp.einsum('sbe,ed->sbd', attn_vec, wo, precision=hp)


if __name__ == "__main__":
    key = jax.random.PRNGKey(0)
    k_h, k_q, k_kv, k_o = jax.random.split(key, 4)

    # deterministic "parameters" (stored as (in, out), i.e. nn.Linear.weight.T)
    wq = jax.random.normal(k_q, (D_MODEL, N_HEAD * D_HEAD), jnp.float32) * 0.1
    wkv = jax.random.normal(k_kv, (D_MODEL, 2 * N_HEAD * D_HEAD), jnp.float32) * 0.1
    wo = jax.random.normal(k_o, (N_HEAD * D_HEAD, D_MODEL), jnp.float32) * 0.1

    # input h: (seq, batch, d_model) — seq-first, like the PyTorch module
    h = jax.random.normal(k_h, (SEQ, BATCH, D_MODEL), jnp.float32)

    out = jax.block_until_ready(multi_head_attn(h, wq, wkv, wo))
    ref = jax.block_until_ready(_reference(h, wq, wkv, wo))

    # Softmax reciprocal is exact now; remaining slack only covers possible
    # reduced-precision f32 MXU passes in the kernel vs the HIGHEST-precision
    # XLA reference.
    np.testing.assert_allclose(np.asarray(out), np.asarray(ref),
                               rtol=2e-3, atol=2e-3)

    print("KERNEL_OK")
</pallas_src>

<mosaic_0001>
module attributes {stable_mosaic.version = 11 : i64} {
  func.func @_mha_kernel(%arg0: i32, %arg1: memref<16x32xf32, #tpu.memory_space<vmem>>, %arg2: memref<32x48xf32, #tpu.memory_space<vmem>>, %arg3: memref<16x32xf32, #tpu.memory_space<vmem>>, %arg4: memref<16x32xf32, #tpu.memory_space<vmem>>) attributes {dimension_semantics = [#tpu.dimension_semantics<arbitrary>], iteration_bounds = array<i64: 1>, scalar_prefetch = 0 : i64, scratch_operands = 0 : i64, tpu.core_type = #tpu.core_type<tc>, window_params = [{pipeline_mode = #tpu.pipeline_mode<synchronous>, transform_indices = @transform_0, window_bounds = array<i64: 16, 32>}, {pipeline_mode = #tpu.pipeline_mode<synchronous>, transform_indices = @transform_1, window_bounds = array<i64: 32, 48>}, {pipeline_mode = #tpu.pipeline_mode<synchronous>, transform_indices = @transform_2, window_bounds = array<i64: 16, 32>}, {pipeline_mode = #tpu.pipeline_mode<synchronous>, transform_indices = @transform_3, window_bounds = array<i64: 16, 32>}]} {
    %c0 = arith.constant 0 : index
    %c0_0 = arith.constant 0 : index
    %0 = vector.load %arg1[%c0, %c0_0] : memref<16x32xf32, #tpu.memory_space<vmem>>, vector<16x32xf32>
    %c0_1 = arith.constant 0 : index
    %c0_2 = arith.constant 0 : index
    %1 = vector.load %arg2[%c0_1, %c0_2] : memref<32x48xf32, #tpu.memory_space<vmem>>, vector<32x48xf32>
    %cst = arith.constant dense<0.000000e+00> : vector<16x48xf32>
    %2 = tpu.matmul %0, %1, %cst {dimension_numbers = #tpu.dot_dimension_numbers<[1], [0], [0], [1], [0, 0, 1, 1], [], []>} : vector<16x32xf32>, vector<32x48xf32>, vector<16x48xf32> -> vector<16x48xf32>
    %3 = vector.extract_strided_slice %2 {offsets = [0, 0], sizes = [16, 8], strides = [1, 1]} : vector<16x48xf32> to vector<16x8xf32>
    %4 = vector.extract_strided_slice %2 {offsets = [0, 16], sizes = [16, 8], strides = [1, 1]} : vector<16x48xf32> to vector<16x8xf32>
    %5 = vector.extract_strided_slice %2 {offsets = [0, 32], sizes = [16, 8], strides = [1, 1]} : vector<16x48xf32> to vector<16x8xf32>
    %6 = vector.extract_strided_slice %3 {offsets = [0, 0], sizes = [8, 8], strides = [1, 1]} : vector<16x8xf32> to vector<8x8xf32>
    %7 = vector.extract_strided_slice %4 {offsets = [0, 0], sizes = [8, 8], strides = [1, 1]} : vector<16x8xf32> to vector<8x8xf32>
    %8 = vector.extract_strided_slice %5 {offsets = [0, 0], sizes = [8, 8], strides = [1, 1]} : vector<16x8xf32> to vector<8x8xf32>
    %cst_3 = arith.constant dense<0.000000e+00> : vector<8x8xf32>
    %9 = tpu.matmul %6, %7, %cst_3 {dimension_numbers = #tpu.dot_dimension_numbers<[1], [1], [0], [0], [0, 0, 1, 0], [], []>} : vector<8x8xf32>, vector<8x8xf32>, vector<8x8xf32> -> vector<8x8xf32>
    %cst_4 = arith.constant 0.353553385 : f32
    %10 = vector.broadcast %cst_4 : f32 to vector<8x8xf32>
    %11 = arith.mulf %9, %10 : vector<8x8xf32>
    %cst_5 = arith.constant dense<0xFF800000> : vector<8xf32>
    %12 = vector.multi_reduction <maximumf>, %11, %cst_5 [1] : vector<8x8xf32> to vector<8xf32>
    %13 = vector.shape_cast %12 : vector<8xf32> to vector<8x1xf32>
    %14 = vector.broadcast %13 : vector<8x1xf32> to vector<8x8xf32>
    %15 = arith.subf %11, %14 : vector<8x8xf32>
    %16 = math.exp %15 : vector<8x8xf32>
    %cst_6 = arith.constant dense<0.000000e+00> : vector<8xf32>
    %17 = vector.multi_reduction <add>, %16, %cst_6 [1] : vector<8x8xf32> to vector<8xf32>
    %18 = vector.shape_cast %17 : vector<8xf32> to vector<8x1xf32>
    %19 = vector.broadcast %18 : vector<8x1xf32> to vector<8x8xf32>
    %20 = arith.divf %16, %19 : vector<8x8xf32>
    %cst_7 = arith.constant dense<0.000000e+00> : vector<8x8xf32>
    %21 = tpu.matmul %20, %8, %cst_7 {dimension_numbers = #tpu.dot_dimension_numbers<[1], [0], [0], [1], [0, 0, 1, 1], [], []>} : vector<8x8xf32>, vector<8x8xf32>, vector<8x8xf32> -> vector<8x8xf32>
    %22 = vector.extract_strided_slice %3 {offsets = [8, 0], sizes = [8, 8], strides = [1, 1]} : vector<16x8xf32> to vector<8x8xf32>
    %23 = vector.extract_strided_slice %4 {offsets = [8, 0], sizes = [8, 8], strides = [1, 1]} : vector<16x8xf32> to vector<8x8xf32>
    %24 = vector.extract_strided_slice %5 {offsets = [8, 0], sizes = [8, 8], strides = [1, 1]} : vector<16x8xf32> to vector<8x8xf32>
    %cst_8 = arith.constant dense<0.000000e+00> : vector<8x8xf32>
    %25 = tpu.matmul %22, %23, %cst_8 {dimension_numbers = #tpu.dot_dimension_numbers<[1], [1], [0], [0], [0, 0, 1, 0], [], []>} : vector<8x8xf32>, vector<8x8xf32>, vector<8x8xf32> -> vector<8x8xf32>
    %cst_9 = arith.constant 0.353553385 : f32
    %26 = vector.broadcast %cst_9 : f32 to vector<8x8xf32>
    %27 = arith.mulf %25, %26 : vector<8x8xf32>
    %cst_10 = arith.constant dense<0xFF800000> : vector<8xf32>
    %28 = vector.multi_reduction <maximumf>, %27, %cst_10 [1] : vector<8x8xf32> to vector<8xf32>
    %29 = vector.shape_cast %28 : vector<8xf32> to vector<8x1xf32>
    %30 = vector.broadcast %29 : vector<8x1xf32> to vector<8x8xf32>
    %31 = arith.subf %27, %30 : vector<8x8xf32>
    %32 = math.exp %31 : vector<8x8xf32>
    %cst_11 = arith.constant dense<0.000000e+00> : vector<8xf32>
    %33 = vector.multi_reduction <add>, %32, %cst_11 [1] : vector<8x8xf32> to vector<8xf32>
    %34 = vector.shape_cast %33 : vector<8xf32> to vector<8x1xf32>
    %35 = vector.broadcast %34 : vector<8x1xf32> to vector<8x8xf32>
    %36 = arith.divf %32, %35 : vector<8x8xf32>
    %cst_12 = arith.constant dense<0.000000e+00> : vector<8x8xf32>
    %37 = tpu.matmul %36, %24, %cst_12 {dimension_numbers = #tpu.dot_dimension_numbers<[1], [0], [0], [1], [0, 0, 1, 1], [], []>} : vector<8x8xf32>, vector<8x8xf32>, vector<8x8xf32> -> vector<8x8xf32>
    %38 = tpu.concatenate %21, %37 in 0 : vector<8x8xf32>, vector<8x8xf32> -> vector<16x8xf32>
    %39 = vector.extract_strided_slice %2 {offsets = [0, 8], sizes = [16, 8], strides = [1, 1]} : vector<16x48xf32> to vector<16x8xf32>
    %40 = vector.extract_strided_slice %2 {offsets = [0, 24], sizes = [16, 8], strides = [1, 1]} : vector<16x48xf32> to vector<16x8xf32>
    %41 = vector.extract_strided_slice %2 {offsets = [0, 40], sizes = [16, 8], strides = [1, 1]} : vector<16x48xf32> to vector<16x8xf32>
    %42 = vector.extract_strided_slice %39 {offsets = [0, 0], sizes = [8, 8], strides = [1, 1]} : vector<16x8xf32> to vector<8x8xf32>
    %43 = vector.extract_strided_slice %40 {offsets = [0, 0], sizes = [8, 8], strides = [1, 1]} : vector<16x8xf32> to vector<8x8xf32>
    %44 = vector.extract_strided_slice %41 {offsets = [0, 0], sizes = [8, 8], strides = [1, 1]} : vector<16x8xf32> to vector<8x8xf32>
    %cst_13 = arith.constant dense<0.000000e+00> : vector<8x8xf32>
    %45 = tpu.matmul %42, %43, %cst_13 {dimension_numbers = #tpu.dot_dimension_numbers<[1], [1], [0], [0], [0, 0, 1, 0], [], []>} : vector<8x8xf32>, vector<8x8xf32>, vector<8x8xf32> -> vector<8x8xf32>
    %cst_14 = arith.constant 0.353553385 : f32
    %46 = vector.broadcast %cst_14 : f32 to vector<8x8xf32>
    %47 = arith.mulf %45, %46 : vector<8x8xf32>
    %cst_15 = arith.constant dense<0xFF800000> : vector<8xf32>
    %48 = vector.multi_reduction <maximumf>, %47, %cst_15 [1] : vector<8x8xf32> to vector<8xf32>
    %49 = vector.shape_cast %48 : vector<8xf32> to vector<8x1xf32>
    %50 = vector.broadcast %49 : vector<8x1xf32> to vector<8x8xf32>
    %51 = arith.subf %47, %50 : vector<8x8xf32>
    %52 = math.exp %51 : vector<8x8xf32>
    %cst_16 = arith.constant dense<0.000000e+00> : vector<8xf32>
    %53 = vector.multi_reduction <add>, %52, %cst_16 [1] : vector<8x8xf32> to vector<8xf32>
    %54 = vector.shape_cast %53 : vector<8xf32> to vector<8x1xf32>
    %55 = vector.broadcast %54 : vector<8x1xf32> to vector<8x8xf32>
    %56 = arith.divf %52, %55 : vector<8x8xf32>
    %cst_17 = arith.constant dense<0.000000e+00> : vector<8x8xf32>
    %57 = tpu.matmul %56, %44, %cst_17 {dimension_numbers = #tpu.dot_dimension_numbers<[1], [0], [0], [1], [0, 0, 1, 1], [], []>} : vector<8x8xf32>, vector<8x8xf32>, vector<8x8xf32> -> vector<8x8xf32>
    %58 = vector.extract_strided_slice %39 {offsets = [8, 0], sizes = [8, 8], strides = [1, 1]} : vector<16x8xf32> to vector<8x8xf32>
    %59 = vector.extract_strided_slice %40 {offsets = [8, 0], sizes = [8, 8], strides = [1, 1]} : vector<16x8xf32> to vector<8x8xf32>
    %60 = vector.extract_strided_slice %41 {offsets = [8, 0], sizes = [8, 8], strides = [1, 1]} : vector<16x8xf32> to vector<8x8xf32>
    %cst_18 = arith.constant dense<0.000000e+00> : vector<8x8xf32>
    %61 = tpu.matmul %58, %59, %cst_18 {dimension_numbers = #tpu.dot_dimension_numbers<[1], [1], [0], [0], [0, 0, 1, 0], [], []>} : vector<8x8xf32>, vector<8x8xf32>, vector<8x8xf32> -> vector<8x8xf32>
    %cst_19 = arith.constant 0.353553385 : f32
    %62 = vector.broadcast %cst_19 : f32 to vector<8x8xf32>
    %63 = arith.mulf %61, %62 : vector<8x8xf32>
    %cst_20 = arith.constant dense<0xFF800000> : vector<8xf32>
    %64 = vector.multi_reduction <maximumf>, %63, %cst_20 [1] : vector<8x8xf32> to vector<8xf32>
    %65 = vector.shape_cast %64 : vector<8xf32> to vector<8x1xf32>
    %66 = vector.broadcast %65 : vector<8x1xf32> to vector<8x8xf32>
    %67 = arith.subf %63, %66 : vector<8x8xf32>
    %68 = math.exp %67 : vector<8x8xf32>
    %cst_21 = arith.constant dense<0.000000e+00> : vector<8xf32>
    %69 = vector.multi_reduction <add>, %68, %cst_21 [1] : vector<8x8xf32> to vector<8xf32>
    %70 = vector.shape_cast %69 : vector<8xf32> to vector<8x1xf32>
    %71 = vector.broadcast %70 : vector<8x1xf32> to vector<8x8xf32>
    %72 = arith.divf %68, %71 : vector<8x8xf32>
    %cst_22 = arith.constant dense<0.000000e+00> : vector<8x8xf32>
    %73 = tpu.matmul %72, %60, %cst_22 {dimension_numbers = #tpu.dot_dimension_numbers<[1], [0], [0], [1], [0, 0, 1, 1], [], []>} : vector<8x8xf32>, vector<8x8xf32>, vector<8x8xf32> -> vector<8x8xf32>
    %74 = tpu.concatenate %57, %73 in 0 : vector<8x8xf32>, vector<8x8xf32> -> vector<16x8xf32>
    %75 = tpu.concatenate %38, %74 in 1 : vector<16x8xf32>, vector<16x8xf32> -> vector<16x16xf32>
    %c0_23 = arith.constant 0 : index
    %c0_24 = arith.constant 0 : index
    %76 = vector.load %arg3[%c0_23, %c0_24] : memref<16x32xf32, #tpu.memory_space<vmem>>, vector<16x32xf32>
    %cst_25 = arith.constant dense<0.000000e+00> : vector<16x32xf32>
    %77 = tpu.matmul %75, %76, %cst_25 {dimension_numbers = #tpu.dot_dimension_numbers<[1], [0], [0], [1], [0, 0, 1, 1], [], []>} : vector<16x16xf32>, vector<16x32xf32>, vector<16x32xf32> -> vector<16x32xf32>
    %c0_26 = arith.constant 0 : index
    %c0_27 = arith.constant 0 : index
    %78 = vector.load %arg4[%c0_26, %c0_27] : memref<16x32xf32, #tpu.memory_space<vmem>>, vector<16x32xf32>
    tpu.vector_store %arg4[%c0_26, %c0_27], %77 {strides = array<i32>} : memref<16x32xf32, #tpu.memory_space<vmem>>, vector<16x32xf32>,
    return
  }
  func.func @transform_0(%arg0: i32) -> (i32, i32) {
    %c0_i32 = arith.constant 0 : i32
    %c0_i32_0 = arith.constant 0 : i32
    %c0_i32_1 = arith.constant 0 : i32
    return %c0_i32, %c0_i32_0 : i32, i32
  }
  func.func @transform_1(%arg0: i32) -> (i32, i32) {
    %c0_i32 = arith.constant 0 : i32
    %c0_i32_0 = arith.constant 0 : i32
    %c0_i32_1 = arith.constant 0 : i32
    return %c0_i32, %c0_i32_0 : i32, i32
  }
  func.func @transform_2(%arg0: i32) -> (i32, i32) {
    %c0_i32 = arith.constant 0 : i32
    %c0_i32_0 = arith.constant 0 : i32
    %c0_i32_1 = arith.constant 0 : i32
    return %c0_i32, %c0_i32_0 : i32, i32
  }
  func.func @transform_3(%arg0: i32) -> (i32, i32) {
    %c0_i32 = arith.constant 0 : i32
    %c0_i32_0 = arith.constant 0 : i32
    %c0_i32_1 = arith.constant 0 : i32
    return %c0_i32, %c0_i32_0 : i32, i32
  }
}

</mosaic_0001>

<bundles_post_ra>
// kernel: multi_head_attn.1
= control target key start
LH: loop header
LB: loop body
LE: loop exit
PB: predicated region body
PF: predicated region fallthrough
CT: control target
= control target key end

     0   :  { %vm20_vm0 = vcmask 261120   ;;  %s451_s24 = smov 112   ;;  %s453_s25 = smov 120   ;;  %vm53_vm1 = vcmask 64512   ;;  %s557_s1 = inlined_call_operand.vmem [shape: f32[32,48], index: 1, kind: input, shape index: {}]   ;;  %s558_s0 = inlined_call_operand.vmem [shape: f32[16,32], index: 0, kind: input, shape index: {}]   ;;  %s559_s2 = inlined_call_operand.vmem [shape: f32[16,32], index: 2, kind: input, shape index: {}]   ;;  %s560_s3 = inlined_call_operand.vmem [shape: f32[16,32], index: 3, kind: output, shape index: {}]  }
   0x1   :  { %v19_v0 = vld [vmem:[%s557_s1 + $0x18] sm:$0xff]  ;;  %v18_v1 = vld [vmem:[%s557_s1 + $0x10] sm:$0xff]  ;;  %v17_v2 = vld [vmem:[%s557_s1 + $0x8] sm:$0xff]  ;;  %s454_s26 = smov 104   ;;  %s456_s29 = smov 8  }
   0x2   :  { %39 = vmatpush.msra.mxu0 %v19_v0  ;;  %v16_v3 = vld [vmem:[%s557_s1] sm:$0xff]  ;;  %v15_v5 = vld [vmem:[%s558_s0 + $0x8] sm:$0xff]  ;;  %s452_s1 = smov 96  }
   0x3   :  { %v14_v4 = vld [vmem:[%s558_s0] sm:$0xff]  ;;  %s455_s0 = smov 88  }
   0x4   :  { %40 = vmatpush.msra.mxu0 %v18_v1 }
   0x6   :  { %41 = vmatpush.msra.mxu0 %v17_v2 }
   0x8   :  { %42 = vmatpush.msra.mxu0 %v16_v3 }
   0x9   :  { %413 = vmatmul.msk.f32.vlgmr.msra.gmra.mxu0 %vm20_vm0, %v14_v4 }
  0x11   :  { %414 = vmatmul.msk.f32.gmra.mxu0 %vm20_vm0, %v15_v5 }
  0x86   :  { %v497_v6 = vpop.f32.mrf.mxu0 }
  0x87   :  { %51 = vrot.lane.b32.xlu0 %v497_v6, %s451_s24 }
  0x8e   :  { %v500_v7 = vpop.f32.mrf.mxu0 }
  0x8f   :  { %130 = vrot.lane.b32.xlu0 %v500_v7, %s451_s24 }
  0x97   :  { %103 = vrot.lane.b32.xlu0 %v497_v6, %s452_s1 }
  0x9f   :  { %207 = vrot.lane.b32.xlu0 %v497_v6, %s453_s25 }
  0xa7   :  { %288 = vrot.lane.b32.xlu0 %v500_v7, %s454_s26 }
  0xaf   :  { %286 = vrot.lane.b32.xlu0 %v500_v7, %s453_s25 }
  0xf9   :  { %v52_v8 = vpop.permute.xlu0 %51 }
  0xfa   :  { %415 = vmatpush.xpose.msk.msra.mxu1 %vm53_vm1, %v52_v8 }
  0xfd   :  { %416 = vmatmul.msk.f32.vlgmr.msra.gmra.mxu1 %vm53_vm1, %v497_v6 }
 0x101   :  { %v131_v9 = vpop.permute.xlu0 %130 }
 0x102   :  { %418 = vmatpush.xpose.msk.msrb.mxu0 %vm53_vm1, %v131_v9 }
 0x105   :  { %419 = vmatmul.msk.f32.vlgmr.msrb.gmra.mxu0 %vm53_vm1, %v500_v7 }
 0x109   :  { %v104_v10 = vpop.permute.xlu0 %103 }
 0x10a   :  { %124 = vmatpush.msra.mxu2 %v104_v10 }
 0x111   :  { %v208_v28 = vpop.permute.xlu0 %207 }
 0x119   :  { %v289_v47 = vpop.permute.xlu0 %288 }
 0x121   :  { %v287_v57 = vpop.permute.xlu0 %286 }
 0x17a   :  { %v75_v11 = vpop.f32.mrf.mxu1 }
 0x17b   :  { %v78_v12 = vmul.f32 0.35355338, %v75_v11 }
 0x17d   :  { %v79_v13 = vsel %vm53_vm1, %v78_v12, -inf }
 0x17e   :  { %80 = vmax.xlane.f32.xlu1 %v79_v13 }
 0x182   :  { %v153_v14 = vpop.f32.mrf.mxu0 }
 0x183   :  { %v156_v15 = vmul.f32 0.35355338, %v153_v14 }
 0x185   :  { %v157_v16 = vsel %vm53_vm1, %v156_v15, -inf }
 0x186   :  { %158 = vmax.xlane.f32.xlu1 %v157_v16 }
 0x19f   :  { %209 = vrot.lane.b32.xlu1 %v497_v6, %s454_s26 }
 0x1f1   :  { %v81_v17 = vpop.xlane.xlu1 %80 }
 0x1f2   :  { %v82_v18 = vsub.f32 %v78_v12, %v81_v17 }
 0x1f4   :  { %v83_v19 = vmul.f32 1.442695, %v82_v18 }
 0x1f6   :  { %435 = vpow2.f32 %v83_v19 }
 0x1f9   :  { %v159_v20 = vpop.xlane.xlu1 %158 }
 0x1fa   :  { %v160_v21 = vsub.f32 %v156_v15, %v159_v20 }
 0x1fc   :  { %v436_v22 = vpop.eup %435  ;;  %v161_v23 = vmul.f32 1.442695, %v160_v21 }
 0x1fd   :  { %v85_v24 = vsel %vm53_vm1, %v436_v22, 0.0 }
 0x1fe   :  { %437 = vpow2.f32 %v161_v23  ;;  %86 = vadd.xlane.f32.xlu2 %v85_v24  ;;  %v376_v24 = vld [vmem:[%s559_s2 + $0x8] sm:$0xff] }
 0x204   :  { %v438_v25 = vpop.eup %437 }
 0x205   :  { %v163_v26 = vsel %vm53_vm1, %v438_v25, 0.0 }
 0x206   :  { %164 = vadd.xlane.f32.xlu2 %v163_v26 }
 0x211   :  { %v210_v27 = vpop.permute.xlu1 %209 }
 0x212   :  { %421 = vmatpush.xpose.msk.msrb.mxu1 %vm53_vm1, %v210_v27 }
 0x215   :  { %422 = vmatmul.msk.f32.vlgmr.msrb.gmra.mxu1 %vm53_vm1, %v208_v28 }
 0x21e   :  { %181 = vrot.lane.b32.xlu2 %v500_v7, %s452_s1 }
 0x271   :  { %v87_v29 = vpop.xlane.xlu2 %86 }
 0x272   :  { %439 = vrcp.f32 %v87_v29  ;;  %v99_v34 = vand.u32 2147483648, %v87_v29  ;;  %v97_v36 = vand.u32 2147483647, %v87_v29  ;;  %vm93_vm3 = vweird.f32 %v87_v29 }
 0x274   :  { %v100_v39 = vor.u32 1.1754944e-38, %v99_v34  ;;  %vm98_vm5 = vcmp.eq.f32.partialorder %v97_v36, 8.507059e+37 }
 0x278   :  { %v440_v30 = vpop.eup %439 }
 0x279   :  { %v89_v31 = vmul.f32 %v440_v30, %v87_v29  ;;  %v165_v32 = vpop.xlane.xlu2 %164  ;;  %vm94_vm2 = vweird.f32 %v440_v30 }
 0x27a   :  { %441 = vrcp.f32 %v165_v32  ;;  %vm95_vm4 = vmor %vm93_vm3, %vm94_vm2  ;;  %v177_v46 = vand.u32 2147483648, %v165_v32  ;;  %v175_v49 = vand.u32 2147483647, %v165_v32  ;;  %vm171_vm7 = vweird.f32 %v165_v32 }
 0x27b   :  { %v90_v33 = vsub.f32 1.0, %v89_v31 }
 0x27c   :  { %v178_v51 = vor.u32 1.1754944e-38, %v177_v46  ;;  %vm176_vm9 = vcmp.eq.f32.partialorder %v175_v49, 8.507059e+37 }
 0x27d   :  { %v91_v35 = vmul.f32 %v440_v30, %v90_v33 }
 0x27f   :  { %v92_v37 = vadd.f32 %v440_v30, %v91_v35 }
 0x280   :  { %v442_v38 = vpop.eup %441 }
 0x281   :  { %v167_v40 = vmul.f32 %v442_v38, %v165_v32  ;;  %v182_v41 = vpop.permute.xlu2 %181  ;;  %v96_v42 = vsel %vm95_vm4, %v440_v30, %v92_v37  ;;  %vm172_vm6 = vweird.f32 %v442_v38  ;;  %vm377_vm4 = vcmask 130048  }
 0x282   :  { %202 = vmatpush.msrb.mxu2 %v182_v41  ;;  %v101_v43 = vsel %vm98_vm5, %v100_v39, %v96_v42  ;;  %vm173_vm8 = vmor %vm171_vm7, %vm172_vm6 }
 0x283   :  { %v168_v44 = vsub.f32 1.0, %v167_v40  ;;  %v102_v45 = vmul.f32 %v436_v22, %v101_v43 }
 0x285   :  { %v169_v48 = vmul.f32 %v442_v38, %v168_v44  ;;  %417 = vmatmul.msk.f32.vlgmr.msra.gmra.mxu2 %vm53_vm1, %v102_v45 }
 0x286   :  { %424 = vmatpush.xpose.msk.msra.mxu2 %vm53_vm1, %v289_v47 }
 0x287   :  { %v170_v50 = vadd.f32 %v442_v38, %v169_v48 }
 0x289   :  { %v174_v52 = vsel %vm173_vm8, %v442_v38, %v170_v50  ;;  %v375_v38 = vld [vmem:[%s559_s2] sm:$0xff] }
 0x28a   :  { %v179_v53 = vsel %vm176_vm9, %v178_v51, %v174_v52 }
 0x28b   :  { %v180_v54 = vmul.f32 %v438_v25, %v179_v53 }
 0x28d   :  { %420 = vmatmul.msk.f32.vlgmr.msrb.gmra.mxu2 %vm53_vm1, %v180_v54 }
 0x292   :  { %v232_v55 = vpop.f32.mrf.mxu1 }
 0x293   :  { %v235_v56 = vmul.f32 0.35355338, %v232_v55 }
 0x295   :  { %425 = vmatmul.msk.f32.vlgmr.msra.gmra.mxu2 %vm53_vm1, %v287_v57  ;;  %v236_v58 = vsel %vm53_vm1, %v235_v56, -inf }
 0x296   :  { %237 = vmax.xlane.f32.xlu2 %v236_v58 }
 0x308   :  { %v528_v59 = vpop.f32.mrf.mxu2 }
 0x309   :  { %v238_v60 = vpop.xlane.xlu2 %237 }
 0x30a   :  { %v239_v61 = vsub.f32 %v235_v56, %v238_v60 }
 0x30c   :  { %v240_v62 = vmul.f32 1.442695, %v239_v61 }
 0x30e   :  { %443 = vpow2.f32 %v240_v62 }
 0x310   :  { %v530_v63 = vpop.f32.mrf.mxu2 }
 0x314   :  { %v444_v0 = vpop.eup %443 }
 0x315   :  { %v242_v1 = vsel %vm53_vm1, %v444_v0, 0.0 }
 0x316   :  { %243 = vadd.xlane.f32.xlu0 %v242_v1 }
 0x318   :  { %v311_v2 = vpop.f32.mrf.mxu2 }
 0x319   :  { %v314_v3 = vmul.f32 0.35355338, %v311_v2 }
 0x31b   :  { %v315_v4 = vsel %vm53_vm1, %v314_v3, -inf }
 0x31c   :  { %316 = vmax.xlane.f32.xlu1 %v315_v4 }
 0x335   :  { %260 = vrot.lane.b32.xlu1 %v497_v6, %s455_s0 }
 0x389   :  { %v244_v5 = vpop.xlane.xlu0 %243 }
 0x38a   :  { %445 = vrcp.f32 %v244_v5  ;;  %v256_v18 = vand.u32 2147483648, %v244_v5  ;;  %vm250_vm11 = vweird.f32 %v244_v5  ;;  %v254_v19 = vand.u32 2147483647, %v244_v5 }
 0x38c   :  { %v257_v20 = vor.u32 1.1754944e-38, %v256_v18  ;;  %vm255_vm13 = vcmp.eq.f32.partialorder %v254_v19, 8.507059e+37 }
 0x38f   :  { %v317_v8 = vpop.xlane.xlu1 %316 }
 0x390   :  { %v446_v9 = vpop.eup %445  ;;  %v318_v10 = vsub.f32 %v314_v3, %v317_v8 }
 0x391   :  { %v246_v11 = vmul.f32 %v446_v9, %v244_v5  ;;  %vm251_vm10 = vweird.f32 %v446_v9 }
 0x392   :  { %v319_v12 = vmul.f32 1.442695, %v318_v10  ;;  %vm252_vm12 = vmor %vm250_vm11, %vm251_vm10 }
 0x393   :  { %v247_v13 = vsub.f32 1.0, %v246_v11 }
 0x394   :  { %447 = vpow2.f32 %v319_v12 }
 0x395   :  { %v248_v14 = vmul.f32 %v446_v9, %v247_v13 }
 0x397   :  { %v249_v17 = vadd.f32 %v446_v9, %v248_v14 }
 0x399   :  { %v253_v6 = vsel %vm252_vm12, %v446_v9, %v249_v17 }
 0x39a   :  { %v448_v15 = vpop.eup %447  ;;  %v258_v21 = vsel %vm255_vm13, %v257_v20, %v253_v6 }
 0x39b   :  { %v321_v16 = vsel %vm53_vm1, %v448_v15, 0.0  ;;  %v259_v23 = vmul.f32 %v444_v0, %v258_v21 }
 0x39c   :  { %322 = vadd.xlane.f32.xlu2 %v321_v16 }
 0x3a7   :  { %v261_v22 = vpop.permute.xlu1 %260 }
 0x3a8   :  { %281 = vmatpush.msra.mxu3 %v261_v22 }
 0x3a9   :  { %423 = vmatmul.msk.f32.vlgmr.msra.gmra.mxu3 %vm53_vm1, %v259_v23 }
 0x3aa   :  { %398 = vmatpush.msrb.mxu3 %v376_v24 }
 0x3ac   :  { %399 = vmatpush.msrb.mxu3 %v375_v38 }
 0x3b4   :  { %339 = vrot.lane.b32.xlu2 %v500_v7, %s455_s0 }
 0x40f   :  { %v323_v25 = vpop.xlane.xlu2 %322 }
 0x410   :  { %449 = vrcp.f32 %v323_v25  ;;  %v335_v30 = vand.u32 2147483648, %v323_v25  ;;  %v333_v32 = vand.u32 2147483647, %v323_v25  ;;  %vm329_vm15 = vweird.f32 %v323_v25 }
 0x412   :  { %v336_v7 = vor.u32 1.1754944e-38, %v335_v30  ;;  %vm334_vm3 = vcmp.eq.f32.partialorder %v333_v32, 8.507059e+37 }
 0x416   :  { %v450_v26 = vpop.eup %449 }
 0x417   :  { %v325_v27 = vmul.f32 %v450_v26, %v323_v25  ;;  %v340_v28 = vpop.permute.xlu2 %339  ;;  %vm330_vm14 = vweird.f32 %v450_v26 }
 0x418   :  { %360 = vmatpush.msra.mxu1 %v340_v28  ;;  %vm331_vm2 = vmor %vm329_vm15, %vm330_vm14 }
 0x419   :  { %v326_v29 = vsub.f32 1.0, %v325_v27 }
 0x41b   :  { %v327_v31 = vmul.f32 %v450_v26, %v326_v29 }
 0x41d   :  { %v328_v33 = vadd.f32 %v450_v26, %v327_v31 }
 0x41f   :  { %v332_v34 = vsel %vm331_vm2, %v450_v26, %v328_v33 }
 0x420   :  { %v337_v35 = vsel %vm334_vm3, %v336_v7, %v332_v34 }
 0x421   :  { %v338_v36 = vmul.f32 %v448_v15, %v337_v35 }
 0x423   :  { %426 = vmatmul.msk.f32.vlgmr.msra.gmra.mxu1 %vm53_vm1, %v338_v36 }
 0x42c   :  { %v283_v37 = vpop.f32.mrf.mxu3 }
 0x42d   :  { %367 = vrot.lane.b32.xlu0 %v283_v37, %s456_s29 }
 0x49f   :  { %v368_v39 = vpop.permute.xlu0 %367 }
 0x4a0   :  { %v373_v40 = vsel %vm53_vm1, %v528_v59, %v368_v39  ;;  %v362_v41 = vpop.f32.mrf.mxu1 }
 0x4a1   :  { %369 = vrot.lane.b32.xlu1 %v362_v41, %s456_s29  ;;  %427 = vmatmul.msk.f32.vlgmr.msrb.gmra.mxu3 %vm377_vm4, %v373_v40 }
 0x513   :  { %v370_v42 = vpop.permute.xlu1 %369 }
 0x514   :  { %v374_v43 = vsel %vm53_vm1, %v530_v63, %v370_v42 }
 0x515   :  { %428 = vmatmul.msk.f32.gmra.mxu3 %vm377_vm4, %v374_v43 }
 0x524   :  { %v401_v44 = vpop.f32.mrf.mxu3 }
 0x525   :  { %407 = vst.msk [vmem:[%s560_s3] sm:$0xff] %vm20_vm0, %v401_v44 }
 0x598   :  { %v404_v45 = vpop.f32.mrf.mxu3 }
 0x599   :  { %408 = vst.msk [vmem:[%s560_s3 + $0x8] sm:$0xff] %vm20_vm0, %v404_v45 }

</bundles_post_ra>
